<compile_context>
chip_gen: v5e
topology: v5e:2x2
jax: 0.10.0
libtpu: 0.0.40
codegen_flags: <defaults>
</compile_context>

<pallas_src>
import functools

import jax
import jax.numpy as jnp
from jax.experimental import pallas as pl
from jax.experimental.pallas import tpu as pltpu


def _conv_im2col_kernel(x_ref, w_ref, b_ref, o_ref, col_ref, *, k, wp, l):
    """One (batch, O-tile) step.

    x_ref:   (C, Hp*Wp)   bf16  reflection-padded image, spatial flattened
    w_ref:   (TO, K*K*C)  bf16  weight matrix, columns ordered (p, q, c)
    b_ref:   (TO, 1)      f32   bias column
    o_ref:   (TO, L)            wide output tile, L = H*Wp - (K-1), lanes = L
    col_ref: (K*K*C, L)   bf16  VMEM im2col scratch
    """
    c = x_ref.shape[0]
    # Assemble the im2col tile once: K*K static lane-offset slice copies.
    for p in range(k):
        for q in range(k):
            t = p * k + q
            col_ref[t * c:(t + 1) * c, :] = x_ref[:, p * wp + q: p * wp + q + l]
    # Single MXU contraction over K*K*C with f32 accumulation.
    acc = jnp.dot(w_ref[...], col_ref[...], preferred_element_type=jnp.float32)
    o_ref[...] = (acc + b_ref[...]).astype(o_ref.dtype)


def conv2d_same(x, weight, bias, kernel_size):
    """Equivalent of Conv2dSame.forward: ReflectionPad2d((ka,kb,ka,kb)) + Conv2d.

    x: (N, C, H, W) float, weight: (O, C, K, K), bias: (O,). Returns (N, O, H, W).
    """
    n, c, h, w = x.shape
    o = weight.shape[0]
    k = kernel_size
    ka = k // 2
    kb = ka - 1 if k % 2 == 0 else ka
    hp, wp = h + ka + kb, w + ka + kb
    lx = hp * wp                       # flattened padded spatial size
    l = h * wp - (k - 1)               # wide output width (row stride Wp)
    kkc = k * k * c

    # PyTorch ReflectionPad2d((left, right, top, bottom)) = (ka, kb, ka, kb).
    # Keep NCHW (no transpose pass); bf16 cast + free spatial flatten.
    xpad = jnp.pad(x, ((0, 0), (0, 0), (ka, kb), (ka, kb)), mode="reflect")
    xflat = xpad.astype(jnp.bfloat16).reshape(n, c, lx)

    # Weight -> (O, K*K*C) with wm[oc, (p*K+q)*C + ch] == weight[oc, ch, p, q].
    wm = jnp.transpose(weight, (0, 2, 3, 1)).reshape(o, kkc).astype(jnp.bfloat16)
    bcol = bias.astype(jnp.float32).reshape(o, 1)

    # O tile: native MXU widths where divisible (">= 256" fixes the O==256 case).
    if o % 256 == 0 and o >= 256:
        to = 256
    elif o % 128 == 0 and o >= 128:
        to = 128
    else:
        to = o
    n_ot = o // to

    # Per-generation VMEM limit with headroom (~48 MiB v7x, ~96 MiB v5e/v6e).
    try:
        vmem_limit = min(
            int(pltpu.get_tpu_info().vmem_capacity_bytes) * 3 // 4,
            100 * 1024 * 1024)
    except Exception:
        vmem_limit = 64 * 1024 * 1024

    out_dtype = x.dtype
    flops = 2 * n * o * kkc * l
    bytes_accessed = (xflat.size * 2 + wm.size * 2 + bcol.size * 4
                      + n * o * l * jnp.dtype(out_dtype).itemsize)

    kernel = functools.partial(_conv_im2col_kernel, k=k, wp=wp, l=l)

    # TODO(synk): very large H*W images would additionally need a spatial-tile
    # grid axis (overlapping input windows via manual DMA); not needed here.
    out_wide = pl.pallas_call(
        kernel,
        out_shape=jax.ShapeDtypeStruct((n, o, l), out_dtype),
        grid=(n, n_ot),   # O tiles innermost: x block stays VMEM-resident.
        in_specs=[
            pl.BlockSpec((None, c, lx), lambda i, j: (i, 0, 0)),
            pl.BlockSpec((to, kkc), lambda i, j: (j, 0)),
            pl.BlockSpec((to, 1), lambda i, j: (j, 0)),
        ],
        out_specs=pl.BlockSpec((None, to, l), lambda i, j: (i, j, 0)),
        scratch_shapes=[pltpu.VMEM((kkc, l), jnp.bfloat16)],
        compiler_params=pltpu.CompilerParams(
            dimension_semantics=("parallel", "parallel"),
            vmem_limit_bytes=vmem_limit,
        ),
        cost_estimate=pl.CostEstimate(
            flops=flops, transcendentals=0, bytes_accessed=bytes_accessed),
    )(xflat, wm, bcol)

    # Drop the (K-1) junk columns of the row-stride-Wp wide output and reshape
    # to NCHW: a cheap fused pad+reshape+slice, no transpose pass.
    out_wide = jnp.pad(out_wide, ((0, 0), (0, 0), (0, k - 1)))
    return out_wide.reshape(n, o, h, wp)[:, :, :, :w]


if __name__ == "__main__":
    key = jax.random.PRNGKey(0)
    k_x, k_w, k_b = jax.random.split(key, 3)

    N, C_IN, C_OUT, H, W, K = 2, 4, 8, 16, 16, 3

    x = jax.random.normal(k_x, (N, C_IN, H, W), dtype=jnp.float32)

    # Deterministic parameter init (mimics PyTorch's uniform(-1/sqrt(fan_in), ...)).
    fan_in = C_IN * K * K
    bound = 1.0 / (fan_in ** 0.5)
    weight = jax.random.uniform(k_w, (C_OUT, C_IN, K, K), jnp.float32, -bound, bound)
    bias = jax.random.uniform(k_b, (C_OUT,), jnp.float32, -bound, bound)

    out = conv2d_same(x, weight, bias, K)
    out = jax.block_until_ready(out)

    # Pure-JAX reference: reflection pad + VALID conv, with inputs quantized to
    # bf16 (matching the kernel's MXU inputs) and f32 accumulation.
    ka = K // 2
    kb = ka - 1 if K % 2 == 0 else ka
    x_q = x.astype(jnp.bfloat16).astype(jnp.float32)
    w_q = weight.astype(jnp.bfloat16).astype(jnp.float32)
    xpad_ref = jnp.pad(x_q, ((0, 0), (0, 0), (ka, kb), (ka, kb)), mode="reflect")
    ref = jax.lax.conv_general_dilated(
        xpad_ref, w_q, window_strides=(1, 1), padding="VALID",
        dimension_numbers=("NCHW", "OIHW", "NCHW"),
        precision=jax.lax.Precision.HIGHEST) + bias.reshape(1, C_OUT, 1, 1)

    assert out.shape == (N, C_OUT, H, W)
    assert jnp.allclose(out, ref, atol=1e-2, rtol=1e-2), \
        float(jnp.max(jnp.abs(out - ref)))
    print("KERNEL_OK")
</pallas_src>

<mosaic_0001>
module attributes {stable_mosaic.version = 11 : i64} {
  func.func @_conv_im2col_kernel(%arg0: i32, %arg1: i32, %arg2: memref<1x4x324xbf16, #tpu.memory_space<vmem>>, %arg3: memref<8x36xbf16, #tpu.memory_space<vmem>>, %arg4: memref<8x1xf32, #tpu.memory_space<vmem>>, %arg5: memref<1x8x286xf32, #tpu.memory_space<vmem>>, %arg6: memref<36x286xbf16, #tpu.memory_space<vmem>>) attributes {dimension_semantics = [#tpu.dimension_semantics<parallel>, #tpu.dimension_semantics<parallel>], iteration_bounds = array<i64: 2, 1>, scalar_prefetch = 0 : i64, scratch_operands = 1 : i64, tpu.core_type = #tpu.core_type<tc>, window_params = [{transform_indices = @transform_0, window_bounds = array<i64: 1, 4, 324>}, {transform_indices = @transform_1, window_bounds = array<i64: 8, 36>}, {transform_indices = @transform_2, window_bounds = array<i64: 8, 1>}, {transform_indices = @transform_3, window_bounds = array<i64: 1, 8, 286>}]} {
    %c0 = arith.constant 0 : index
    %c0_0 = arith.constant 0 : index
    %c0_1 = arith.constant 0 : index
    %0 = vector.load %arg2[%c0, %c0_0, %c0_1] : memref<1x4x324xbf16, #tpu.memory_space<vmem>>, vector<1x4x286xbf16>
    %1 = vector.shape_cast %0 : vector<1x4x286xbf16> to vector<4x286xbf16>
    %c0_2 = arith.constant 0 : index
    %c0_3 = arith.constant 0 : index
    %2 = vector.load %arg6[%c0_2, %c0_3] : memref<36x286xbf16, #tpu.memory_space<vmem>>, vector<4x286xbf16>
    tpu.vector_store %arg6[%c0_2, %c0_3], %1 {strides = array<i32>} : memref<36x286xbf16, #tpu.memory_space<vmem>>, vector<4x286xbf16>,
    %c0_4 = arith.constant 0 : index
    %c0_5 = arith.constant 0 : index
    %c1 = arith.constant 1 : index
    %3 = vector.load %arg2[%c0_4, %c0_5, %c1] : memref<1x4x324xbf16, #tpu.memory_space<vmem>>, vector<1x4x286xbf16>
    %4 = vector.shape_cast %3 : vector<1x4x286xbf16> to vector<4x286xbf16>
    %c4 = arith.constant 4 : index
    %c0_6 = arith.constant 0 : index
    %5 = vector.load %arg6[%c4, %c0_6] : memref<36x286xbf16, #tpu.memory_space<vmem>>, vector<4x286xbf16>
    tpu.vector_store %arg6[%c4, %c0_6], %4 {strides = array<i32>} : memref<36x286xbf16, #tpu.memory_space<vmem>>, vector<4x286xbf16>,
    %c0_7 = arith.constant 0 : index
    %c0_8 = arith.constant 0 : index
    %c2 = arith.constant 2 : index
    %6 = vector.load %arg2[%c0_7, %c0_8, %c2] : memref<1x4x324xbf16, #tpu.memory_space<vmem>>, vector<1x4x286xbf16>
    %7 = vector.shape_cast %6 : vector<1x4x286xbf16> to vector<4x286xbf16>
    %c8 = arith.constant 8 : index
    %c0_9 = arith.constant 0 : index
    %8 = vector.load %arg6[%c8, %c0_9] : memref<36x286xbf16, #tpu.memory_space<vmem>>, vector<4x286xbf16>
    tpu.vector_store %arg6[%c8, %c0_9], %7 {strides = array<i32>} : memref<36x286xbf16, #tpu.memory_space<vmem>>, vector<4x286xbf16>,
    %c0_10 = arith.constant 0 : index
    %c0_11 = arith.constant 0 : index
    %c18 = arith.constant 18 : index
    %9 = vector.load %arg2[%c0_10, %c0_11, %c18] : memref<1x4x324xbf16, #tpu.memory_space<vmem>>, vector<1x4x286xbf16>
    %10 = vector.shape_cast %9 : vector<1x4x286xbf16> to vector<4x286xbf16>
    %c12 = arith.constant 12 : index
    %c0_12 = arith.constant 0 : index
    %11 = vector.load %arg6[%c12, %c0_12] : memref<36x286xbf16, #tpu.memory_space<vmem>>, vector<4x286xbf16>
    tpu.vector_store %arg6[%c12, %c0_12], %10 {strides = array<i32>} : memref<36x286xbf16, #tpu.memory_space<vmem>>, vector<4x286xbf16>,
    %c0_13 = arith.constant 0 : index
    %c0_14 = arith.constant 0 : index
    %c19 = arith.constant 19 : index
    %12 = vector.load %arg2[%c0_13, %c0_14, %c19] : memref<1x4x324xbf16, #tpu.memory_space<vmem>>, vector<1x4x286xbf16>
    %13 = vector.shape_cast %12 : vector<1x4x286xbf16> to vector<4x286xbf16>
    %c16 = arith.constant 16 : index
    %c0_15 = arith.constant 0 : index
    %14 = vector.load %arg6[%c16, %c0_15] : memref<36x286xbf16, #tpu.memory_space<vmem>>, vector<4x286xbf16>
    tpu.vector_store %arg6[%c16, %c0_15], %13 {strides = array<i32>} : memref<36x286xbf16, #tpu.memory_space<vmem>>, vector<4x286xbf16>,
    %c0_16 = arith.constant 0 : index
    %c0_17 = arith.constant 0 : index
    %c20 = arith.constant 20 : index
    %15 = vector.load %arg2[%c0_16, %c0_17, %c20] : memref<1x4x324xbf16, #tpu.memory_space<vmem>>, vector<1x4x286xbf16>
    %16 = vector.shape_cast %15 : vector<1x4x286xbf16> to vector<4x286xbf16>
    %c20_18 = arith.constant 20 : index
    %c0_19 = arith.constant 0 : index
    %17 = vector.load %arg6[%c20_18, %c0_19] : memref<36x286xbf16, #tpu.memory_space<vmem>>, vector<4x286xbf16>
    tpu.vector_store %arg6[%c20_18, %c0_19], %16 {strides = array<i32>} : memref<36x286xbf16, #tpu.memory_space<vmem>>, vector<4x286xbf16>,
    %c0_20 = arith.constant 0 : index
    %c0_21 = arith.constant 0 : index
    %c36 = arith.constant 36 : index
    %18 = vector.load %arg2[%c0_20, %c0_21, %c36] : memref<1x4x324xbf16, #tpu.memory_space<vmem>>, vector<1x4x286xbf16>
    %19 = vector.shape_cast %18 : vector<1x4x286xbf16> to vector<4x286xbf16>
    %c24 = arith.constant 24 : index
    %c0_22 = arith.constant 0 : index
    %20 = vector.load %arg6[%c24, %c0_22] : memref<36x286xbf16, #tpu.memory_space<vmem>>, vector<4x286xbf16>
    tpu.vector_store %arg6[%c24, %c0_22], %19 {strides = array<i32>} : memref<36x286xbf16, #tpu.memory_space<vmem>>, vector<4x286xbf16>,
    %c0_23 = arith.constant 0 : index
    %c0_24 = arith.constant 0 : index
    %c37 = arith.constant 37 : index
    %21 = vector.load %arg2[%c0_23, %c0_24, %c37] : memref<1x4x324xbf16, #tpu.memory_space<vmem>>, vector<1x4x286xbf16>
    %22 = vector.shape_cast %21 : vector<1x4x286xbf16> to vector<4x286xbf16>
    %c28 = arith.constant 28 : index
    %c0_25 = arith.constant 0 : index
    %23 = vector.load %arg6[%c28, %c0_25] : memref<36x286xbf16, #tpu.memory_space<vmem>>, vector<4x286xbf16>
    tpu.vector_store %arg6[%c28, %c0_25], %22 {strides = array<i32>} : memref<36x286xbf16, #tpu.memory_space<vmem>>, vector<4x286xbf16>,
    %c0_26 = arith.constant 0 : index
    %c0_27 = arith.constant 0 : index
    %c38 = arith.constant 38 : index
    %24 = vector.load %arg2[%c0_26, %c0_27, %c38] : memref<1x4x324xbf16, #tpu.memory_space<vmem>>, vector<1x4x286xbf16>
    %25 = vector.shape_cast %24 : vector<1x4x286xbf16> to vector<4x286xbf16>
    %c32 = arith.constant 32 : index
    %c0_28 = arith.constant 0 : index
    %26 = vector.load %arg6[%c32, %c0_28] : memref<36x286xbf16, #tpu.memory_space<vmem>>, vector<4x286xbf16>
    tpu.vector_store %arg6[%c32, %c0_28], %25 {strides = array<i32>} : memref<36x286xbf16, #tpu.memory_space<vmem>>, vector<4x286xbf16>,
    %c0_29 = arith.constant 0 : index
    %c0_30 = arith.constant 0 : index
    %27 = vector.load %arg3[%c0_29, %c0_30] : memref<8x36xbf16, #tpu.memory_space<vmem>>, vector<8x36xbf16>
    %c0_31 = arith.constant 0 : index
    %c0_32 = arith.constant 0 : index
    %28 = vector.load %arg6[%c0_31, %c0_32] : memref<36x286xbf16, #tpu.memory_space<vmem>>, vector<36x286xbf16>
    %cst = arith.constant dense<0.000000e+00> : vector<8x286xf32>
    %29 = tpu.matmul %27, %28, %cst {dimension_numbers = #tpu.dot_dimension_numbers<[1], [0], [0], [1], [0, 0, 1, 1], [], []>} : vector<8x36xbf16>, vector<36x286xbf16>, vector<8x286xf32> -> vector<8x286xf32>
    %c0_33 = arith.constant 0 : index
    %c0_34 = arith.constant 0 : index
    %30 = vector.load %arg4[%c0_33, %c0_34] : memref<8x1xf32, #tpu.memory_space<vmem>>, vector<8x1xf32>
    %31 = vector.broadcast %30 : vector<8x1xf32> to vector<8x286xf32>
    %32 = arith.addf %29, %31 : vector<8x286xf32>
    %c0_35 = arith.constant 0 : index
    %c0_36 = arith.constant 0 : index
    %c0_37 = arith.constant 0 : index
    %33 = vector.load %arg5[%c0_35, %c0_36, %c0_37] : memref<1x8x286xf32, #tpu.memory_space<vmem>>, vector<1x8x286xf32>
    %34 = vector.shape_cast %33 : vector<1x8x286xf32> to vector<8x286xf32>
    %35 = vector.shape_cast %32 : vector<8x286xf32> to vector<1x8x286xf32>
    tpu.vector_store %arg5[%c0_35, %c0_36, %c0_37], %35 {strides = array<i32>} : memref<1x8x286xf32, #tpu.memory_space<vmem>>, vector<1x8x286xf32>,
    return
  }
  func.func @transform_0(%arg0: i32, %arg1: i32) -> (i32, i32, i32) {
    %c0_i32 = arith.constant 0 : i32
    %c0_i32_0 = arith.constant 0 : i32
    %c0_i32_1 = arith.constant 0 : i32
    return %arg0, %c0_i32, %c0_i32_0 : i32, i32, i32
  }
  func.func @transform_1(%arg0: i32, %arg1: i32) -> (i32, i32) {
    %c0_i32 = arith.constant 0 : i32
    %c0_i32_0 = arith.constant 0 : i32
    return %arg1, %c0_i32 : i32, i32
  }
  func.func @transform_2(%arg0: i32, %arg1: i32) -> (i32, i32) {
    %c0_i32 = arith.constant 0 : i32
    %c0_i32_0 = arith.constant 0 : i32
    return %arg1, %c0_i32 : i32, i32
  }
  func.func @transform_3(%arg0: i32, %arg1: i32) -> (i32, i32, i32) {
    %c0_i32 = arith.constant 0 : i32
    %c0_i32_0 = arith.constant 0 : i32
    return %arg0, %arg1, %c0_i32 : i32, i32, i32
  }
}

</mosaic_0001>

<bundles_post_ra>
// kernel: tpu_custom_call.1
= control target key start
LH: loop header
LB: loop body
LE: loop exit
PB: predicated region body
PF: predicated region fallthrough
CT: control target
= control target key end

     0   :  { %8 = vsyncpa [#allocation4], 0  ;;  %s1085_s0 = inlined_call_operand.hbm [shape: bf16[2,4,324], index: 0, kind: input, shape index: {}]   ;;  %s1086_s1 = inlined_call_operand.vmem [shape: bf16[8,36], index: 1, kind: input, shape index: {}]   ;;  %s1087_s2 = inlined_call_operand.vmem [shape: f32[8,1], index: 2, kind: input, shape index: {}]   ;;  %s1088_s3 = inlined_call_operand.hbm [shape: f32[2,8,286], index: 3, kind: output, shape index: {}]  }
   0x1   :  { %10 = vsyncpa [#allocation4 + $0x1], 0 }
   0x2   :  { %11 = vsyncpa [#allocation5], 0 }
   0x3   :  { %13 = vsyncpa [#allocation5 + $0x1], 0  ;;  %s923_s12 = smov 0   ;;  %s925_s13 = smov 0  }
   0x4   :  { %s927_s14 = smov 0   ;;  %s929_s15 = smov 0  }
   0x5   :  { %s931_s16 = smov 0   ;;  %s933_s17 = smov 0  }
   0x6 LB: > { %s658_s18 = sadd.s32 4294967295, %s892_s17   ;;  %s659_s19 = sadd.s32 4294967294, %s892_s17   ;;  %s892_s17 = sphi %s933_s17, %s19_s17   ;;  %s888_s16 = sphi %s931_s16, %s1097_s16   ;;  %s884_s15 = sphi %s929_s15, %s1096_s15   ;;  %s880_s14 = sphi %s927_s14, %s1095_s14   ;;  %s876_s13 = sphi %s925_s13, %s1094_s13   ;;  %s872_s12 = sphi %s923_s12, %s1093_s12  }
   0x7   : > { %s31_s20 = sadd.s32 1, %s888_s16  ;;  %s38_s21 = sadd.s32 1, %s880_s14 }
   0x8   : > { %p33_p0 = scmp.ge.s32.totalorder %s31_s20, 2  ;;  %p45_p1 = scmp.ne.s32.totalorder %s880_s14, %s876_s13 }
   0x9   : > { %p46_p2 = scmp.eq.s32.totalorder %s892_s17, 0  ;;  %p51_p3 = scmp.ne.s32.totalorder %s876_s13, %s872_s12 }
   0xa   : > { %s1099_s20 = smov (%p33_p0, %s31_s20), 0  ;;  %p52_p5 = scmp.eq.s32.totalorder %s658_s18, 0 }
   0xb   : > { %p964_p4 = por %p46_p2, %p45_p1  ;;  %s35_s23 = ssub.s32 %s888_s16, %s1099_s20 }
   0xc   : > { %p129_p6 = scmp.eq.s32.totalorder %s658_s18, 1  ;;  %p36_p7 = scmp.eq.s32.totalorder %s35_s23, 0 }
   0xd   : > { %p970_p8 = por %p52_p5, %p51_p3  ;;  %p135_p10 = scmp.eq.s32.totalorder %s659_s19, 1 }
   0xe   : > { %p974_p9 = por %p129_p6, %p45_p1  ;;  %p663_p12 = scmp.ge.s32.totalorder %s892_s17, 2 }
   0xf   : > { %s979_s26 = scalar_select %p36_p7, %s880_s14, %s38_s21  }
  0x10   : > { %p981_p11 = por %p135_p10, %p51_p3  ;;  %p719_p13 = scmp.lt.s32.totalorder %s892_s17, 2 }
  0x11   : > { %s169_s28 = sand.u32 1, %s880_s14   ;;  %s703_s30 = smul.u32 6, %s888_s16 }
  0x12   : > { %s702_s29 = smul.u32 6, %s169_s28  ;;  %p712_p0 = pnand %p719_p13, %p964_p4 }
  0x13   : > { %p665_p2 = scmp.ge.s32.totalorder %s892_s17, 1  ;;  %s178_s6 = scalar_lea.hbm %s1085_s0, %s703_s30 }
  0x14   : > { %s173_s7 = scalar_lea.vmem [#allocation3], %s702_s29  ;;  %s180_s9 = sshll.u32 %s178_s6, 4  ;;  %s181_s9 = int_to_ptr.hbm [resolvable:$true] %s180_s9 }
  0x15   : > { %s182_s8 = sshll.u32 %s173_s7, 4  ;;  %s170_s10 = scalar_lea.sflag [#allocation4], %s169_s28  ;;  %s183_s8 = int_to_ptr.vmem [resolvable:$true] %s182_s8 }
  0x16   : > { %714 = dma.hbm_to_vmem [thread:$0]  (!%p712_p0), %s181_s9, 96, %s183_s8, %s170_s10  }
  0x17   : > { %p187_p1 = scmp.lt.s32.totalorder %s892_s17, 3 }
  0x19   : > { %p188_p3 = pnand %p665_p2, %p187_p1 }
  0x1a   : > { %s997_s11 = sand.u32 (!%p188_p3), 1, %s876_s13  }
  0x1b   : > { %191 = sbr.rel (%p188_p3) target bundleno = 396 (0x18c), region = 32  ;;  %s194_s19 = scalar_lea.sflag (!%p188_p3), [#allocation4], %s997_s11 }
  0x1c   : > { %s704_s18 = smul.u32 (!%p188_p3), 6, %s997_s11 }
  0x1e   : > { %s1001_s21 = scalar_lea.vmem (!%p188_p3), [#allocation3], %s704_s18 }
  0x20   : > { %863 = dma.done.wait (%p970_p8), %s194_s19, 96  }
  0x21   : > { %865 = vsyncadd (%p970_p8), %s194_s19, 4294967200  ;;  %v238_v0 = vld [vmem:[%s1001_s21] sm:$0x3f]  ;;  %s894_s22 = smov 127   ;;  %s895_s23 = smov 126   ;;  %vm246_vm0 = vcmask 238592  }
  0x22   : > { %240 = vst [vmem:[#allocation1] ss:$2 sm:$0xff] %v238_v0  ;;  %v248_v1 = vld [vmem:[%s1001_s21] sm:$0x3f]  ;;  %s896_s24 = smov 109   ;;  %s897_s28 = smov 108  }
  0x23   : > { %v271_v4 = vld [vmem:[%s1001_s21] sm:$0x3f]  ;;  %s898_s29 = smov 92   ;;  %s899_s30 = smov 91   ;;  %vm269_vm1 = vcmask 240642   ;;  %vm262_vm2 = vcmask 1043456  }
  0x24   : > { %v291_v7 = vld [vmem:[%s1001_s21] sm:$0x3f]  ;;  %s900_s4 = smov 90   ;;  %s901_s5 = smov 110   ;;  %vm326_vm3 = vcmask 891904   ;;  %vm367_vm4 = vcmask 752640  }
  0x25   : > { %v312_v10 = vld [vmem:[%s1001_s21] sm:$0x3f]  ;;  %vm347_vm5 = vcmask 883712   ;;  %vm285_vm6 = vcmask 1031168   ;;  %vm264_vm7 = vcmask 1039360   ;;  %vm388_vm8 = vcmask 744448  }
  0x26   : > { %v332_v13 = vld [vmem:[%s1001_s21] sm:$0x3f]  ;;  %vm408_vm9 = vcmask 736256   ;;  %vm475_vm10 = vcmask 1041408   ;;  %vm306_vm11 = vcmask 900096   ;;  %vm471_vm12 = vcmask 293888  }
  0x27   : > { %v353_v16 = vld [vmem:[%s1001_s21] sm:$0x3f]  ;;  %s705_s10 = smul.u32 24, %s997_s11  ;;  %vm526_vm13 = vcmask 244736   ;;  %s830_s6 = scalar_lea.hbm %s1088_s3, 48 }
  0x28   : > { %v373_v19 = vld [vmem:[%s1001_s21] sm:$0x3f]  ;;  %s706_s18 = smul.u32 24, %s884_s15  ;;  %s529_s15 = scalar_lea.sflag [#allocation5], %s997_s11 }
  0x29   : > { %v241_v2 = vld.sshfl [vmem:[#allocation1] sm:$0xff pattern:$0x75643120]  ;;  %v242_v3 = vld.sshfl [vmem:[#allocation1 + $0x8] sm:$0xff pattern:$0x75643120] }
  0x2a   : > { %251 = vst [vmem:[#allocation1 + $0x1] ss:$2 sm:$0xff] %v248_v1  ;;  %v394_v22 = vld [vmem:[%s1001_s21] sm:$0x3f] }
  0x2b   : > { %245 = vst [vmem:[#allocation2] sm:$0x33] %v241_v2 }
  0x2c   : > { %247 = vst.msk [vmem:[#allocation2 + $0x8] sm:$0x3] %vm246_vm0, %v242_v3 }
  0x31   : > { %v254_v5 = vld.sshfl [vmem:[#allocation1 + $0x8] sm:$0xff pattern:$0x75643120]  ;;  %v252_v6 = vld.sshfl [vmem:[#allocation1] sm:$0xff pattern:$0x75643120] }
  0x32   : > { %258 = vrot.lane.b32.xlu1 %v254_v5, %s894_s22  ;;  %273 = vst [vmem:[#allocation1] ss:$2 sm:$0xff] %v271_v4  ;;  %v425_v5 = vld [vmem:[%s1087_s2] sm:$0xff] }
  0x39   : > { %v274_v8 = vld.sshfl [vmem:[#allocation1] sm:$0xff pattern:$0x75643120]  ;;  %v276_v9 = vld.sshfl [vmem:[#allocation1 + $0x8] sm:$0xff pattern:$0x75643120] }
  0x3a   : > { %294 = vst [vmem:[#allocation1 + $0x1] ss:$2 sm:$0xff] %v291_v7  ;;  %280 = vrot.lane.b32.xlu2 %v276_v9, %s895_s23 }
  0x41   : > { %v295_v11 = vld.sshfl [vmem:[#allocation1] sm:$0xff pattern:$0x75643120]  ;;  %v297_v12 = vld.sshfl [vmem:[#allocation1 + $0x8] sm:$0xff pattern:$0x75643120] }
  0x42   : > { %314 = vst [vmem:[#allocation1] ss:$2 sm:$0xff] %v312_v10 }
  0x49   : > { %v317_v14 = vld.sshfl [vmem:[#allocation1 + $0x8] sm:$0xff pattern:$0x75643120]  ;;  %v315_v15 = vld.sshfl [vmem:[#allocation1] sm:$0xff pattern:$0x75643120] }
  0x4a   : > { %321 = vrot.lane.b32.xlu1 %v317_v14, %s896_s24  ;;  %335 = vst [vmem:[#allocation1 + $0x1] ss:$2 sm:$0xff] %v332_v13  ;;  %319 = vrot.lane.b32.xlu0 %v315_v15, %s896_s24 }
  0x51   : > { %v338_v17 = vld.sshfl [vmem:[#allocation1 + $0x8] sm:$0xff pattern:$0x75643120]  ;;  %v336_v18 = vld.sshfl [vmem:[#allocation1] sm:$0xff pattern:$0x75643120] }
  0x52   : > { %342 = vrot.lane.b32.xlu1 %v338_v17, %s897_s28  ;;  %355 = vst [vmem:[#allocation1] ss:$2 sm:$0xff] %v353_v16 }
  0x59   : > { %v358_v20 = vld.sshfl [vmem:[#allocation1 + $0x8] sm:$0xff pattern:$0x75643120]  ;;  %v356_v21 = vld.sshfl [vmem:[#allocation1] sm:$0xff pattern:$0x75643120] }
  0x5a   : > { %340 = vrot.lane.b32.xlu1 %v336_v18, %s897_s28  ;;  %362 = vrot.lane.b32.xlu2 %v358_v20, %s898_s29  ;;  %376 = vst [vmem:[#allocation1 + $0x1] ss:$2 sm:$0xff] %v373_v19 }
  0x61   : > { %v379_v23 = vld.sshfl [vmem:[#allocation1 + $0x8] sm:$0xff pattern:$0x75643120]  ;;  %v377_v24 = vld.sshfl [vmem:[#allocation1] sm:$0xff pattern:$0x75643120] }
  0x62   : > { %256 = vrot.lane.b32.xlu1 %v252_v6, %s894_s22  ;;  %381 = vrot.lane.b32.xlu0 %v377_v24, %s899_s30  ;;  %396 = vst [vmem:[#allocation1] ss:$2 sm:$0xff] %v394_v22  ;;  %s542_s22 = scalar_lea.hbm %s1088_s3, %s706_s18 }
  0x63   : > { %360 = vrot.lane.b32.xlu2 %v356_v21, %s898_s29  ;;  %s546_s28 = sshll.u32 %s542_s22, 4  ;;  %s547_s28 = int_to_ptr.hbm [resolvable:$true] %s546_s28 }
  0x64   : > { %s824_s29 = sshra.s32 %s547_s28, 4  ;;  %s825_s29 = int_to_ptr.hbm [resolvable:$true] %s824_s29 }
  0x65   : > { %p831_p7 = scmp.lt.s32.totalorder %s825_s29, %s1088_s3 }
  0x69   : > { %v399_v25 = vld.sshfl [vmem:[#allocation1 + $0x8] sm:$0xff pattern:$0x75643120]  ;;  %v397_v26 = vld.sshfl [vmem:[#allocation1] sm:$0xff pattern:$0x75643120] }
  0x6a   : > { %403 = vrot.lane.b32.xlu0 %v399_v25, %s900_s4 }
  0x6b   : > { %383 = vrot.lane.b32.xlu2 %v379_v23, %s899_s30  ;;  %s826_s30 = scalar_lea.hbm %s825_s29, 24 }
  0x6c   : > { %p827_p4 = scmp.ne.s32.totalorder %s825_s29, %s826_s30  ;;  %p832_p8 = scmp.lt.s32.totalorder %s830_s6, %s826_s30 }
  0x6e   : > { %p828_p5 = pnand %p827_p4, %p974_p9  ;;  %p833_p10 = por %p832_p8, %p831_p7 }
  0x70   : > { %p829_p6 = pneg %p828_p5 }
  0x72   : > { %401 = vrot.lane.b32.xlu0 %v397_v26, %s900_s4  ;;  %p834_p13 = pnand %p833_p10, %p829_p6 }
  0x73   : > { %278 = vrot.lane.b32.xlu2 %v274_v8, %s895_s23  ;;  %v902_v8 = vmov 0   ;;  %s228_s23 = scalar_lea.vmem [#allocation6], %s705_s10 }
  0x74   : > { %778 = vset.pattern.permute.xlu1 %v902_v8  ;;  %779 = vset.pattern.permute.xlu0 %v902_v8  ;;  %s544_s24 = sshll.u32 %s228_s23, 4  ;;  %s545_s24 = int_to_ptr.vmem [resolvable:$true] %s544_s24 }
  0x75   : > { %428 = vperm.xlu1 %778, %v425_v5  }
  0x7a   : > { %301 = vrot.lane.b32.xlu0 %v297_v12, %s901_s5 }
  0x82   : > { %299 = vrot.lane.b32.xlu0 %v295_v11, %s901_s5 }
  0x94   : > { %v281_v27 = vpop.permute.xlu2 %280 }
  0x95   : > { %290 = vst.msk [vmem:[#allocation2 + $0x14] sm:$0x3] %vm246_vm0, %v281_v27  ;;  %v283_v44 = vrot.slane %v281_v27, 4 }
  0xa4   : > { %v259_v28 = vpop.permute.xlu1 %258 }
  0xa5   : > { %270 = vst.msk [vmem:[#allocation2 + $0x8] sm:$0xc] %vm269_vm1, %v259_v28  ;;  %v261_v53 = vrot.slane %v259_v28, 4 }
  0xac   : > { %v676_v20 = vld [vmem:[#allocation2 + $0x8] sm:$0xf] }
  0xb4   : > { %v363_v29 = vpop.permute.xlu2 %362 }
  0xb5   : > { %372 = vst.msk [vmem:[#allocation2 + $0x2c] sm:$0x3] %vm246_vm0, %v363_v29  ;;  %v365_v31 = vrot.slane %v363_v29, 4 }
  0xbc   : > { %v322_v30 = vpop.permute.xlu1 %321  ;;  %v320_v32 = vpop.permute.xlu0 %319 }
  0xbd   : > { %v324_v33 = vrot.slane %v322_v30, 4  ;;  %331 = vst.msk [vmem:[#allocation2 + $0x20] sm:$0x3] %vm246_vm0, %v322_v30  ;;  %v361_v34 = vpop.permute.xlu2 %360  ;;  %v323_v35 = vrot.slane %v320_v32, 4 }
  0xbe   : > { %v364_v36 = vrot.slane %v361_v34, 4 }
  0xbf   : > { %v325_v37 = vsel %vm262_vm2, %v323_v35, %v324_v33 }
  0xc0   : > { %v366_v38 = vsel %vm262_vm2, %v364_v36, %v365_v31  ;;  %v327_v39 = vsel %vm326_vm3, %v320_v32, %v325_v37  ;;  %v414_v36 = vld [vmem:[%s1086_s1] sm:$0xf] }
  0xc1   : > { %v368_v40 = vsel %vm367_vm4, %v361_v34, %v366_v38  ;;  %330 = vst [vmem:[#allocation2 + $0x18] sm:$0x33] %v327_v39 }
  0xc2   : > { %371 = vst [vmem:[#allocation2 + $0x24] sm:$0x33] %v368_v40 }
  0xc4   : > { %v343_v41 = vpop.permute.xlu1 %342 }
  0xc5   : > { %352 = vst.msk [vmem:[#allocation2 + $0x20] sm:$0xc] %vm269_vm1, %v343_v41  ;;  %v384_v42 = vpop.permute.xlu2 %383  ;;  %v345_v43 = vrot.slane %v343_v41, 4 }
  0xc6   : > { %393 = vst.msk [vmem:[#allocation2 + $0x2c] sm:$0xc] %vm269_vm1, %v384_v42  ;;  %v386_v54 = vrot.slane %v384_v42, 4 }
  0xcc   : > { %v341_v45 = vpop.permute.xlu1 %340  ;;  %v688_v10 = vld [vmem:[#allocation2 + $0x20] sm:$0xf] }
  0xcd   : > { %v344_v46 = vrot.slane %v341_v45, 4  ;;  %v279_v47 = vpop.permute.xlu2 %278  ;;  %v701_v12 = vld [vmem:[#allocation2 + $0x28] sm:$0xf0] }
  0xce   : > { %v282_v48 = vrot.slane %v279_v47, 4  ;;  %v689_v14 = vor.u32 %v701_v12, %v688_v10 }
  0xcf   : > { %v346_v49 = vsel %vm262_vm2, %v344_v46, %v345_v43 }
  0xd0   : > { %v348_v50 = vsel %vm347_vm5, %v341_v45, %v346_v49  ;;  %v284_v51 = vsel %vm262_vm2, %v282_v48, %v283_v44 }
  0xd1   : > { %351 = vst [vmem:[#allocation2 + $0x18] sm:$0xcc] %v348_v50  ;;  %v286_v52 = vsel %vm285_vm6, %v279_v47, %v284_v51 }
  0xd2   : > { %289 = vst [vmem:[#allocation2 + $0xc] sm:$0x33] %v286_v52 }
  0xd4   : > { %v257_v55 = vpop.permute.xlu1 %256  ;;  %v382_v56 = vpop.permute.xlu0 %381 }
  0xd5   : > { %v260_v57 = vrot.slane %v257_v55, 4  ;;  %v385_v58 = vrot.slane %v382_v56, 4 }
  0xd7   : > { %v263_v59 = vsel %vm262_vm2, %v260_v57, %v261_v53  ;;  %v387_v60 = vsel %vm262_vm2, %v385_v58, %v386_v54 }
  0xd8   : > { %v265_v61 = vsel %vm264_vm7, %v257_v55, %v263_v59  ;;  %v389_v62 = vsel %vm388_vm8, %v382_v56, %v387_v60  ;;  %v680_v31 = vld [vmem:[#allocation2 + $0x18] sm:$0xf]  ;;  %v699_v32 = vld [vmem:[#allocation2 + $0x1c] sm:$0xf] }
  0xd9   : > { %268 = vst [vmem:[#allocation2] sm:$0xcc] %v265_v61 }
  0xda   : > { %392 = vst [vmem:[#allocation2 + $0x24] sm:$0xcc] %v389_v62 }
  0xdc   : > { %v404_v63 = vpop.permute.xlu0 %403 }
  0xdd   : > { %413 = vst.msk [vmem:[#allocation2 + $0x38] sm:$0x3] %vm246_vm0, %v404_v63  ;;  %v406_v2 = vrot.slane %v404_v63, 4 }
  0xe0   : > { %v668_v37 = vld [vmem:[#allocation2] sm:$0xf]  ;;  %v696_v39 = vld [vmem:[#allocation2 + $0x4] sm:$0xf] }
  0xe1   : > { %v700_v24 = vld [vmem:[#allocation2 + $0x20] sm:$0xf0]  ;;  %v682_v29 = vld [vmem:[#allocation2 + $0x24] sm:$0xf0] }
  0xe2   : > { %v681_v34 = vor.u32 %v700_v24, %v680_v31  ;;  %v685_v35 = vor.u32 %v699_v32, %v682_v29 }
  0xe4   : > { %v402_v0 = vpop.permute.xlu0 %401  ;;  %v424_v1 = vld [vmem:[#allocation2 + $0x38] sm:$0x3] }
  0xe5   : > { %v405_v3 = vrot.slane %v402_v0, 4  ;;  %v455_v4 = vunpack.c.l.b16 %v424_v1 }
  0xe7   : > { %v407_v6 = vsel %vm262_vm2, %v405_v3, %v406_v2  ;;  %v464_v7 = vpack.c.b16 %v455_v4, %v455_v4  ;;  %v429_v43 = vpop.permute.xlu1 %428 }
  0xe8   : > { %v409_v9 = vsel %vm408_vm9, %v402_v0, %v407_v6 }
  0xe9   : > { %412 = vst [vmem:[#allocation2 + $0x30] sm:$0x33] %v409_v9  ;;  %v483_v11 = vsel %vm475_vm10, %v464_v7, 0 }
  0xea   : > { %516 = vmatpush.bf16.msra.mxu2 %v483_v11 }
  0xec   : > { %v302_v13 = vpop.permute.xlu0 %301 }
  0xed   : > { %311 = vst.msk [vmem:[#allocation2 + $0x14] sm:$0xc] %vm269_vm1, %v302_v13  ;;  %v304_v21 = vrot.slane %v302_v13, 4 }
  0xee   : > { %517 = vmatpush.bf16.msra.mxu2 %v689_v14 }
  0xf0   : > { %v423_v15 = vld [vmem:[#allocation2 + $0x30] sm:$0x33] }
  0xf1   : > { %v453_v16 = vunpack.c.l.b16 %v423_v15  ;;  %v454_v17 = vunpack.c.h.b16 %v423_v15 }
  0xf3   : > { %v462_v18 = vpack.c.b16 %v453_v16, %v453_v16  ;;  %v463_v19 = vpack.c.b16 %v454_v17, %v454_v17 }
  0xf4   : > { %v300_v22 = vpop.permute.xlu0 %299  ;;  %v698_v23 = vld [vmem:[#allocation2 + $0x10] sm:$0xf0] }
  0xf5   : > { %v303_v25 = vrot.slane %v300_v22, 4  ;;  %v477_v26 = vsel %vm475_vm10, %v462_v18, 0  ;;  %v480_v27 = vsel %vm475_vm10, %v463_v19, 0  ;;  %v677_v28 = vor.u32 %v698_v23, %v676_v20 }
  0xf6   : > { %490 = vmatpush.bf16.msra.mxu0 %v477_v26  ;;  %503 = vmatpush.bf16.msra.mxu1 %v480_v27 }
  0xf7   : > { %v305_v30 = vsel %vm262_vm2, %v303_v25, %v304_v21  ;;  %518 = vmatpush.bf16.msra.mxu2 %v677_v28 }
  0xf8   : > { %v307_v33 = vsel %vm306_vm11, %v300_v22, %v305_v30 }
  0xf9   : > { %310 = vst [vmem:[#allocation2 + $0xc] sm:$0xcc] %v307_v33 }
  0xfa   : > { %491 = vmatpush.bf16.msra.mxu0 %v681_v34  ;;  %504 = vmatpush.bf16.msra.mxu1 %v685_v35 }
  0xfb   : > { %692 = vmatmul.msk.bf16.vlgmr.msra.gmra.mxu2 %vm471_vm12, %v414_v36 }
 0x100   : > { %v697_v38 = vld [vmem:[#allocation2 + $0x8] sm:$0xf0]  ;;  %v670_v40 = vld [vmem:[#allocation2 + $0xc] sm:$0xf0] }
 0x101   : > { %v669_v41 = vor.u32 %v697_v38, %v668_v37  ;;  %v673_v42 = vor.u32 %v696_v39, %v670_v40 }
 0x103   : > { %492 = vmatpush.bf16.msra.mxu0 %v669_v41  ;;  %505 = vmatpush.bf16.msra.mxu1 %v673_v42 }
 0x106   : > { %690 = vmatmul.msk.bf16.vlgmr.msra.gmra.mxu0 %vm471_vm12, %v414_v36  ;;  %691 = vmatmul.msk.bf16.vlgmr.msra.gmra.mxu1 %vm471_vm12, %v414_v36 }
 0x17e   : > { %v520_v44 = vpop.f32.mrf.mxu2 }
 0x17f   : > { %v521_v45 = vadd.f32 %v520_v44, %v429_v43 }
 0x181   : > { %527 = vst.msk [vmem:[%s228_s23 + $0x10] sm:$0xff] %vm526_vm13, %v521_v45 }
 0x183   : > { %v494_v46 = vpop.f32.mrf.mxu0  ;;  %v507_v47 = vpop.f32.mrf.mxu1 }
 0x184   : > { %v495_v48 = vadd.f32 %v494_v46, %v429_v43  ;;  %v508_v49 = vadd.f32 %v507_v47, %v429_v43 }
 0x186   : > { %524 = vst [vmem:[%s228_s23] sm:$0xff] %v495_v48  ;;  %v522_v50 = vpop.f32.mrf.mxu2 }
 0x187   : > { %525 = vst [vmem:[%s228_s23 + $0x8] sm:$0xff] %v508_v49 }
 0x188   : > { %837 = shalt.err (!%p834_p13)
}
 0x189   : > { %709 = dma.vmem_to_hbm [thread:$0]  (%p974_p9), %s545_s24, 384, %s547_s28, %s529_s15  }
 0x18b   : > { %v496_v51 = vpop.f32.mrf.mxu0  ;;  %v509_v52 = vpop.f32.mrf.mxu1 }
 0x18c PF: > { %s558_s11 = sand.u32 1, %s872_s12   ;;  %p716_p0 = pnand %p663_p12, %p981_p11 }
 0x18d   : > { %s559_s9 = scalar_lea.sflag [#allocation5], %s558_s11 }
 0x18e   : > { %p717_p2 = pneg %p716_p0 }
 0x190   : > { %867 = dma.done.wait (%p717_p2), %s559_s9, 384  }
 0x191   : > { %869 = vsyncadd (%p717_p2), %s559_s9, 4294966912  ;;  %s19_s17 = sadd.s32 1, %s892_s17   ;;  %s1093_s12 = smov %s876_s13 }
 0x192   : > { %p16_p1 = scmp.ge.s32.totalorder %s19_s17, 4   ;;  %s1094_s13 = smov %s880_s14 }
 0x193   : > { %s1095_s14 = smov %s979_s26  ;;  %s1096_s15 = smov %s888_s16 }
 0x194   : > { %s1097_s16 = smov %s1099_s20  ;;  %18 = sbr.rel (!%p16_p1) target bundleno = 6 (0x6), region = 87 }
 0x199   :  { %565 = vsyncpa [#allocation4], 1 }
 0x19a   :  { %567 = vsyncpa [#allocation4 + $0x1], 1 }
 0x19b   :  { %568 = vsyncpa [#allocation5], 1 }
 0x19c   :  { %570 = vsyncpa [#allocation5 + $0x1], 1 }

</bundles_post_ra>
